<compile_context>
chip_gen: v7x
topology: tpu7x:2x2x1
jax: 0.10.0
libtpu: 0.0.40
codegen_flags: <defaults>
</compile_context>

<pallas_src>
import jax
import jax.numpy as jnp
from jax.experimental import pallas as pl
from jax.experimental.pallas import tpu as pltpu


def _round_up(x, m):
    return ((x + m - 1) // m) * m


def mlp_kernel(x_ref, w1_ref, b1_ref, w2_ref, b2_ref, w3_ref, b3_ref, o_ref):
    # Layer 1: Linear -> ReLU (Dropout is identity in eval mode).
    # MXU matmul in the input dtype (bf16 fast path) with f32 accumulation;
    # bias-add and ReLU stay in f32 (safe on v5e, free on v6e/v7x).
    h1 = jnp.dot(x_ref[...], w1_ref[...], preferred_element_type=jnp.float32)
    h1 = jnp.maximum(h1 + b1_ref[...], 0.0).astype(w2_ref.dtype)

    # Layer 2: Linear -> ReLU
    h2 = jnp.dot(h1, w2_ref[...], preferred_element_type=jnp.float32)
    h2 = jnp.maximum(h2 + b2_ref[...], 0.0).astype(w3_ref.dtype)

    # Layer 3: Linear (logits)
    out = jnp.dot(h2, w3_ref[...], preferred_element_type=jnp.float32) + b3_ref[...]
    o_ref[...] = out.astype(o_ref.dtype)


def prepare_params(w1, b1, w2, b2, w3, b3, *, compute_dtype=jnp.bfloat16):
    """One-time parameter prep (hoisted out of the per-call path).

    Weights are cast to compute_dtype (bf16 halves weight DMA + VMEM and is
    MXU-fast); biases stay f32 and are reshaped to (1, N) (added to the f32
    accumulator inside the kernel).
    """
    return (
        w1.astype(compute_dtype),
        jnp.reshape(b1, (1, -1)).astype(jnp.float32),
        w2.astype(compute_dtype),
        jnp.reshape(b2, (1, -1)).astype(jnp.float32),
        w3.astype(compute_dtype),
        jnp.reshape(b3, (1, -1)).astype(jnp.float32),
    )


def _choose_tile_b(B, tile_b_req):
    """Batch tile: multiple of 8, large, but with >= 2 grid steps when B
    allows so both v7x TensorCores get work (harmless on v5e/v6e)."""
    B8 = _round_up(B, 8)
    tb = min(_round_up(max(tile_b_req, 8), 8), B8)
    if B8 >= 16 and tb > B8 // 2:
        tb = max(8, (B8 // 2) // 8 * 8)
    return tb


def _vmem_limit_bytes(tile_b, in_f, mid, out_f, csize):
    """Actual VMEM need (double-buffered I/O tiles + resident weights +
    f32 intermediates) with headroom, capped below v7x's 64 MiB physical."""
    act = tile_b * (in_f * csize + out_f * 4)
    wgt = csize * (in_f * mid + mid * in_f + in_f * out_f)
    bias = 4 * (mid + in_f + out_f)
    interm = 4 * tile_b * (mid + in_f + out_f)
    need = 2 * act + 2 * (wgt + bias) + interm
    return int(min(max(2 * need + (1 << 20), 4 << 20), 48 << 20))


def multioutput_regression(x, params, *, tile_b=512):
    """Fused 3-layer MLP forward.

    x: (B, in_features) f32.  params: output of prepare_params().
    Returns (B, out_features) in x.dtype.
    """
    w1, b1, w2, b2, w3, b3 = params
    B, in_features = x.shape
    middle = w1.shape[1]
    out_features = w3.shape[1]
    compute_dtype = w1.dtype
    csize = jnp.dtype(compute_dtype).itemsize

    tb = _choose_tile_b(B, tile_b)
    B_p = _round_up(B, tb)
    grid = (B_p // tb,)

    # Cast activations to the MXU compute dtype (halves x DMA for bf16); pad
    # the batch dim only if needed (feature dims are passed unpadded —
    # full-extent block dims, so no lane-pad pass and no output slice pass).
    x_c = x.astype(compute_dtype)
    if B_p != B:
        x_c = jnp.pad(x_c, ((0, B_p - B), (0, 0)))

    out = pl.pallas_call(
        mlp_kernel,
        out_shape=jax.ShapeDtypeStruct((B_p, out_features), jnp.float32),
        grid=grid,
        in_specs=[
            # batch tile of activations (last dim = full array dim, legal)
            pl.BlockSpec((tb, in_features), lambda i: (i, 0)),
            # grid-invariant weights / biases (same block every step)
            pl.BlockSpec((in_features, middle), lambda i: (0, 0)),
            pl.BlockSpec((1, middle), lambda i: (0, 0)),
            pl.BlockSpec((middle, in_features), lambda i: (0, 0)),
            pl.BlockSpec((1, in_features), lambda i: (0, 0)),
            pl.BlockSpec((in_features, out_features), lambda i: (0, 0)),
            pl.BlockSpec((1, out_features), lambda i: (0, 0)),
        ],
        out_specs=pl.BlockSpec((tb, out_features), lambda i: (i, 0)),
        compiler_params=pltpu.CompilerParams(
            dimension_semantics=("parallel",),
            vmem_limit_bytes=_vmem_limit_bytes(
                tb, in_features, middle, out_features, csize),
        ),
    )(x_c, w1, b1, w2, b2, w3, b3)

    if B_p != B:
        out = out[:B]
    return out.astype(x.dtype)


def reference_mlp(x, w1, b1, w2, b2, w3, b3):
    h1 = jnp.maximum(x @ w1 + b1, 0.0)
    h2 = jnp.maximum(h1 @ w2 + b2, 0.0)
    return h2 @ w3 + b3


if __name__ == "__main__":
    # Deterministic configuration (module-consistent small feature dims; batch
    # large enough that the grid has >= 2 steps so both v7x TensorCores work).
    batch = 512
    in_features = 32
    middle_neurons = 64
    out_features = 16
    p = 0.5  # dropout prob (identity in eval mode)

    key = jax.random.PRNGKey(0)
    kx, k1, k2, k3, k4, k5, k6 = jax.random.split(key, 7)

    x = jax.random.normal(kx, (batch, in_features), dtype=jnp.float32)

    # Deterministic parameter init (Kaiming-ish scaling), stored (fan_in, fan_out).
    w1 = jax.random.normal(k1, (in_features, middle_neurons), jnp.float32) * (1.0 / in_features) ** 0.5
    b1 = jax.random.normal(k2, (1, middle_neurons), jnp.float32) * 0.01
    w2 = jax.random.normal(k3, (middle_neurons, in_features), jnp.float32) * (1.0 / middle_neurons) ** 0.5
    b2 = jax.random.normal(k4, (1, in_features), jnp.float32) * 0.01
    w3 = jax.random.normal(k5, (in_features, out_features), jnp.float32) * (1.0 / in_features) ** 0.5
    b3 = jax.random.normal(k6, (1, out_features), jnp.float32) * 0.01

    ref = reference_mlp(x, w1, b1, w2, b2, w3, b3)

    # One-time parameter prep (hoisted out of the per-call path).
    params_f32 = jax.block_until_ready(
        prepare_params(w1, b1, w2, b2, w3, b3, compute_dtype=jnp.float32))
    params_bf16 = jax.block_until_ready(
        prepare_params(w1, b1, w2, b2, w3, b3, compute_dtype=jnp.bfloat16))

    # Strict correctness check: f32 compute path.
    out_f32 = multioutput_regression(x, params_f32, tile_b=512)
    out_f32 = jax.block_until_ready(out_f32)
    assert out_f32.shape == (batch, out_features)
    assert jnp.allclose(out_f32, ref, atol=2e-5, rtol=2e-5), "f32 mismatch vs reference"

    # Fast path: bf16 inputs/weights, f32 accumulation (looser tolerance).
    out_bf16 = multioutput_regression(x, params_bf16, tile_b=512)
    out_bf16 = jax.block_until_ready(out_bf16)
    assert out_bf16.shape == (batch, out_features)
    assert jnp.allclose(out_bf16, ref, atol=7e-2, rtol=7e-2), "bf16 mismatch vs reference"

    print("KERNEL_OK")
</pallas_src>

<mosaic_0001>
module attributes {stable_mosaic.version = 11 : i64} {
  func.func @mlp_kernel(%arg0: i32, %arg1: memref<256x32xf32, #tpu.memory_space<vmem>>, %arg2: memref<32x64xf32, #tpu.memory_space<vmem>>, %arg3: memref<1x64xf32, #tpu.memory_space<vmem>>, %arg4: memref<64x32xf32, #tpu.memory_space<vmem>>, %arg5: memref<1x32xf32, #tpu.memory_space<vmem>>, %arg6: memref<32x16xf32, #tpu.memory_space<vmem>>, %arg7: memref<1x16xf32, #tpu.memory_space<vmem>>, %arg8: memref<256x16xf32, #tpu.memory_space<vmem>>) attributes {dimension_semantics = [#tpu.dimension_semantics<parallel>], iteration_bounds = array<i64: 2>, scalar_prefetch = 0 : i64, scratch_operands = 0 : i64, tpu.core_type = #tpu.core_type<tc>, window_params = [{transform_indices = @transform_0, window_bounds = array<i64: 256, 32>}, {pipeline_mode = #tpu.pipeline_mode<synchronous>, transform_indices = @transform_1, window_bounds = array<i64: 32, 64>}, {pipeline_mode = #tpu.pipeline_mode<synchronous>, transform_indices = @transform_2, window_bounds = array<i64: 1, 64>}, {pipeline_mode = #tpu.pipeline_mode<synchronous>, transform_indices = @transform_3, window_bounds = array<i64: 64, 32>}, {pipeline_mode = #tpu.pipeline_mode<synchronous>, transform_indices = @transform_4, window_bounds = array<i64: 1, 32>}, {pipeline_mode = #tpu.pipeline_mode<synchronous>, transform_indices = @transform_5, window_bounds = array<i64: 32, 16>}, {pipeline_mode = #tpu.pipeline_mode<synchronous>, transform_indices = @transform_6, window_bounds = array<i64: 1, 16>}, {transform_indices = @transform_7, window_bounds = array<i64: 256, 16>}]} {
    %c0 = arith.constant 0 : index
    %c0_0 = arith.constant 0 : index
    %0 = vector.load %arg1[%c0, %c0_0] : memref<256x32xf32, #tpu.memory_space<vmem>>, vector<256x32xf32>
    %c0_1 = arith.constant 0 : index
    %c0_2 = arith.constant 0 : index
    %1 = vector.load %arg2[%c0_1, %c0_2] : memref<32x64xf32, #tpu.memory_space<vmem>>, vector<32x64xf32>
    %cst = arith.constant dense<0.000000e+00> : vector<256x64xf32>
    %2 = tpu.matmul %0, %1, %cst {dimension_numbers = #tpu.dot_dimension_numbers<[1], [0], [0], [1], [0, 0, 1, 1], [], []>} : vector<256x32xf32>, vector<32x64xf32>, vector<256x64xf32> -> vector<256x64xf32>
    %c0_3 = arith.constant 0 : index
    %c0_4 = arith.constant 0 : index
    %3 = vector.load %arg3[%c0_3, %c0_4] : memref<1x64xf32, #tpu.memory_space<vmem>>, vector<1x64xf32>
    %4 = vector.broadcast %3 : vector<1x64xf32> to vector<256x64xf32>
    %5 = arith.addf %2, %4 : vector<256x64xf32>
    %cst_5 = arith.constant 0.000000e+00 : f32
    %6 = vector.broadcast %cst_5 : f32 to vector<256x64xf32>
    %7 = arith.maximumf %5, %6 : vector<256x64xf32>
    %c0_6 = arith.constant 0 : index
    %c0_7 = arith.constant 0 : index
    %8 = vector.load %arg4[%c0_6, %c0_7] : memref<64x32xf32, #tpu.memory_space<vmem>>, vector<64x32xf32>
    %cst_8 = arith.constant dense<0.000000e+00> : vector<256x32xf32>
    %9 = tpu.matmul %7, %8, %cst_8 {dimension_numbers = #tpu.dot_dimension_numbers<[1], [0], [0], [1], [0, 0, 1, 1], [], []>} : vector<256x64xf32>, vector<64x32xf32>, vector<256x32xf32> -> vector<256x32xf32>
    %c0_9 = arith.constant 0 : index
    %c0_10 = arith.constant 0 : index
    %10 = vector.load %arg5[%c0_9, %c0_10] : memref<1x32xf32, #tpu.memory_space<vmem>>, vector<1x32xf32>
    %11 = vector.broadcast %10 : vector<1x32xf32> to vector<256x32xf32>
    %12 = arith.addf %9, %11 : vector<256x32xf32>
    %cst_11 = arith.constant 0.000000e+00 : f32
    %13 = vector.broadcast %cst_11 : f32 to vector<256x32xf32>
    %14 = arith.maximumf %12, %13 : vector<256x32xf32>
    %c0_12 = arith.constant 0 : index
    %c0_13 = arith.constant 0 : index
    %15 = vector.load %arg6[%c0_12, %c0_13] : memref<32x16xf32, #tpu.memory_space<vmem>>, vector<32x16xf32>
    %cst_14 = arith.constant dense<0.000000e+00> : vector<256x16xf32>
    %16 = tpu.matmul %14, %15, %cst_14 {dimension_numbers = #tpu.dot_dimension_numbers<[1], [0], [0], [1], [0, 0, 1, 1], [], []>} : vector<256x32xf32>, vector<32x16xf32>, vector<256x16xf32> -> vector<256x16xf32>
    %c0_15 = arith.constant 0 : index
    %c0_16 = arith.constant 0 : index
    %17 = vector.load %arg7[%c0_15, %c0_16] : memref<1x16xf32, #tpu.memory_space<vmem>>, vector<1x16xf32>
    %18 = vector.broadcast %17 : vector<1x16xf32> to vector<256x16xf32>
    %19 = arith.addf %16, %18 : vector<256x16xf32>
    %c0_17 = arith.constant 0 : index
    %c0_18 = arith.constant 0 : index
    %20 = vector.load %arg8[%c0_17, %c0_18] : memref<256x16xf32, #tpu.memory_space<vmem>>, vector<256x16xf32>
    tpu.vector_store %arg8[%c0_17, %c0_18], %19 {strides = array<i32>} : memref<256x16xf32, #tpu.memory_space<vmem>>, vector<256x16xf32>,
    return
  }
  func.func @transform_0(%arg0: i32) -> (i32, i32) {
    %c0_i32 = arith.constant 0 : i32
    %c0_i32_0 = arith.constant 0 : i32
    return %arg0, %c0_i32 : i32, i32
  }
  func.func @transform_1(%arg0: i32) -> (i32, i32) {
    %c0_i32 = arith.constant 0 : i32
    %c0_i32_0 = arith.constant 0 : i32
    %c0_i32_1 = arith.constant 0 : i32
    return %c0_i32, %c0_i32_0 : i32, i32
  }
  func.func @transform_2(%arg0: i32) -> (i32, i32) {
    %c0_i32 = arith.constant 0 : i32
    %c0_i32_0 = arith.constant 0 : i32
    %c0_i32_1 = arith.constant 0 : i32
    return %c0_i32, %c0_i32_0 : i32, i32
  }
  func.func @transform_3(%arg0: i32) -> (i32, i32) {
    %c0_i32 = arith.constant 0 : i32
    %c0_i32_0 = arith.constant 0 : i32
    %c0_i32_1 = arith.constant 0 : i32
    return %c0_i32, %c0_i32_0 : i32, i32
  }
  func.func @transform_4(%arg0: i32) -> (i32, i32) {
    %c0_i32 = arith.constant 0 : i32
    %c0_i32_0 = arith.constant 0 : i32
    %c0_i32_1 = arith.constant 0 : i32
    return %c0_i32, %c0_i32_0 : i32, i32
  }
  func.func @transform_5(%arg0: i32) -> (i32, i32) {
    %c0_i32 = arith.constant 0 : i32
    %c0_i32_0 = arith.constant 0 : i32
    %c0_i32_1 = arith.constant 0 : i32
    return %c0_i32, %c0_i32_0 : i32, i32
  }
  func.func @transform_6(%arg0: i32) -> (i32, i32) {
    %c0_i32 = arith.constant 0 : i32
    %c0_i32_0 = arith.constant 0 : i32
    %c0_i32_1 = arith.constant 0 : i32
    return %c0_i32, %c0_i32_0 : i32, i32
  }
  func.func @transform_7(%arg0: i32) -> (i32, i32) {
    %c0_i32 = arith.constant 0 : i32
    %c0_i32_0 = arith.constant 0 : i32
    return %arg0, %c0_i32 : i32, i32
  }
}

</mosaic_0001>

<bundles_post_ra>
// kernel: tpu_custom_call.1
= control target key start
LH: loop header
LB: loop body
LE: loop exit
PB: predicated region body
PF: predicated region fallthrough
CT: control target
= control target key end

     0   :  { %s1959_s24 = smov 0   ;;  %s2350_s0 = inlined_call_operand.vmem [shape: f32[512,32], index: 0, kind: input, shape index: {}]   ;;  %s2351_s1 = inlined_call_operand.vmem [shape: f32[32,64], index: 1, kind: input, shape index: {}]   ;;  %s2352_s2 = inlined_call_operand.vmem [shape: f32[1,64], index: 2, kind: input, shape index: {}]   ;;  %s2353_s3 = inlined_call_operand.vmem [shape: f32[64,32], index: 3, kind: input, shape index: {}]   ;;  %s2354_s4 = inlined_call_operand.vmem [shape: f32[1,32], index: 4, kind: input, shape index: {}]   ;;  %s2355_s5 = inlined_call_operand.vmem [shape: f32[32,16], index: 5, kind: input, shape index: {}]   ;;  %s2356_s6 = inlined_call_operand.vmem [shape: f32[1,16], index: 6, kind: input, shape index: {}]   ;;  %s2357_s7 = inlined_call_operand.vmem [shape: f32[512,16], index: 7, kind: output, shape index: {}]  }
   0x1 LB: > { %s1469_s25 = sadd.s32 4294967295, %s1917_s24   ;;  %p1473_p0 = scmp.ge.s32.totalorder %s1917_s24, 1  ;;  %s1917_s24 = sphi %s1959_s24, %s17_s24  }
   0x2   : > { %p238_p1 = scmp.lt.s32.totalorder %s1917_s24, 3 }
   0x4   : > { %p239_p2 = pnand %p1473_p0, %p238_p1 }
   0x5   : > { %v314_v0 = vld [vmem:[%s2351_s1] sm:$0xff] (!%p239_p2)  ;;  %v315_v1 = vld [vmem:[%s2351_s1 + $0x8] sm:$0xff] (!%p239_p2)  ;;  %v316_v2 = vld [vmem:[%s2351_s1 + $0x10] sm:$0xff] (!%p239_p2)  ;;  %s1474_s9 = sshll.u32 (!%p239_p2), %s1469_s25, 5  ;;  %vm325_vm0 = vcmask (!%p239_p2), 261120   ;;  %vm694_vm1 = vcmask (!%p239_p2), 523264  }
   0x6   : > { %242 = sbr.rel (%p239_p2) target bundleno = 730 (0x2da), region = 48  ;;  %v1867_v3 = vpack.c.bf16 (!%p239_p2), %v315_v1, %v314_v0  ;;  %v317_v4 = vld [vmem:[%s2351_s1 + $0x18] sm:$0xff] (!%p239_p2)  ;;  %p271_p3 = scmp.lt.s32.totalorder (!%p239_p2), %s1474_s9, 63  ;;  %v679_v6 = vld [vmem:[%s2353_s3] sm:$0xff] (!%p239_p2)  ;;  %v680_v7 = vld [vmem:[%s2353_s3 + $0x8] sm:$0xff] (!%p239_p2)  ;;  %vm1380_vm2 = vcmask (!%p239_p2), 130048  }
   0x7   : > { %v1871_v5 = vpack.c.bf16 (!%p239_p2), %v317_v4, %v316_v2  ;;  %v1875_v8 = vpack.c.bf16 (!%p239_p2), %v680_v7, %v679_v6  ;;  %v681_v12 = vld [vmem:[%s2353_s3 + $0x10] sm:$0xff] (!%p239_p2)  ;;  %v682_v13 = vld [vmem:[%s2353_s3 + $0x18] sm:$0xff] (!%p239_p2)  ;;  %v683_v20 = vld [vmem:[%s2353_s3 + $0x20] sm:$0xff] (!%p239_p2) }
   0x8   : > { %1868 = vmatprep.subr.bf16.mxu0 (!%p239_p2), %v1867_v3  ;;  %1899 = vmatprep.subr.bf16.mxu1 (!%p239_p2), %v1867_v3  ;;  %v1879_v19 = vpack.c.bf16 (!%p239_p2), %v682_v13, %v681_v12  ;;  %v684_v21 = vld [vmem:[%s2353_s3 + $0x28] sm:$0xff] (!%p239_p2)  ;;  %v685_v27 = vld [vmem:[%s2353_s3 + $0x30] sm:$0xff] (!%p239_p2)  ;;  %v686_v28 = vld [vmem:[%s2353_s3 + $0x38] sm:$0xff] (!%p239_p2) }
   0x9   : > { %1870 = vmatpush3.bf16.msra.mxu0 (!%p239_p2), %v1867_v3  ;;  %1901 = vmatpush3.bf16.msra.mxu1 (!%p239_p2), %v1867_v3  ;;  %v1883_v26 = vpack.c.bf16 (!%p239_p2), %v684_v21, %v683_v20  ;;  %v1887_v33 = vpack.c.bf16 (!%p239_p2), %v686_v28, %v685_v27  ;;  %v1048_v50 = vld [vmem:[%s2355_s5] sm:$0xff] (!%p239_p2)  ;;  %v1049_v51 = vld [vmem:[%s2355_s5 + $0x8] sm:$0xff] (!%p239_p2)  ;;  %v1050_v52 = vld [vmem:[%s2355_s5 + $0x10] sm:$0xff] (!%p239_p2) }
   0xa   : > { %1872 = vmatprep.subr.bf16.mxu0 (!%p239_p2), %v1871_v5  ;;  %1900 = vmatprep.subr.bf16.mxu1 (!%p239_p2), %v1871_v5  ;;  %v1891_v53 = vpack.c.bf16 (!%p239_p2), %v1049_v51, %v1048_v50  ;;  %v1051_v54 = vld [vmem:[%s2355_s5 + $0x18] sm:$0xff] (!%p239_p2)  ;;  %v2092_v56 = vld [vmem:[%s2352_s2] ss:$0 sm:$0xff] (!%p239_p2) }
   0xb   : > { %v1895_v55 = vpack.c.bf16 (!%p239_p2), %v1051_v54, %v1050_v52 }
   0xd   : > { %s2359_s9 = smov (!%p271_p3, %s1474_s9), 63  ;;  %1874 = vmatpush3.bf16.msra.mxu0 %v1871_v5  ;;  %1902 = vmatpush3.bf16.msra.mxu1 %v1871_v5 }
   0xe   : > { %s1475_s16 = sshll.u32 %s2359_s9, 3  ;;  %1876 = vmatprep.subr.bf16.mxu1 %v1875_v8  ;;  %1892 = vmatprep.subr.bf16.mxu0 %v1891_v53 }
   0xf   : > { %s1993_s19 = scalar_lea.vmem %s2350_s0, %s1475_s16  ;;  %s2249_s29 = scalar_lea.vmem %s2357_s7, %s1475_s16 }
  0x10   : > { %v282_v9 = vld [vmem:[%s1993_s19] sm:$0xff]  ;;  %v283_v10 = vld [vmem:[%s1993_s19 + $0x8] sm:$0xff]  ;;  %v284_v11 = vld [vmem:[%s1993_s19 + $0x10] sm:$0xff] }
  0x11   : > { %1699 = vmatprep.mubr.msk.f32.mxu0 %vm325_vm0, %v282_v9  ;;  %v285_v14 = vld [vmem:[%s1993_s19 + $0x18] sm:$0xff]  ;;  %v298_v15 = vld [vmem:[%s1993_s19 + $0x80] sm:$0xff]  ;;  %v299_v16 = vld [vmem:[%s1993_s19 + $0x88] sm:$0xff] }
  0x12   : > { %1700 = vmatmul.mubr.msk.f32.vlgmr.msra.gmra.mrb[0].mxu0 %vm325_vm0, %v283_v10  ;;  %v286_v17 = vld [vmem:[%s1993_s19 + $0x20] sm:$0xff]  ;;  %1723 = vmatprep.mubr.msk.f32.mxu1 %vm325_vm0, %v298_v15  ;;  %v300_v18 = vld [vmem:[%s1993_s19 + $0x90] sm:$0xff]  ;;  %v301_v22 = vld [vmem:[%s1993_s19 + $0x98] sm:$0xff] }
  0x13   : > { %1702 = vmatprep.mubr.msk.f32.mxu0 %vm325_vm0, %v284_v11  ;;  %1724 = vmatmul.mubr.msk.f32.vlgmr.msra.gmra.mrb[0].mxu1 %vm325_vm0, %v299_v16  ;;  %v287_v23 = vld [vmem:[%s1993_s19 + $0x28] sm:$0xff]  ;;  %v302_v24 = vld [vmem:[%s1993_s19 + $0xa0] sm:$0xff]  ;;  %v288_v25 = vld [vmem:[%s1993_s19 + $0x30] sm:$0xff] }
  0x14   : > { %1726 = vmatprep.mubr.msk.f32.mxu1 %vm325_vm0, %v300_v18  ;;  %1878 = vmatpush3.bf16.msra.mxu1 %v1875_v8  ;;  %v303_v29 = vld [vmem:[%s1993_s19 + $0xa8] sm:$0xff]  ;;  %v289_v30 = vld [vmem:[%s1993_s19 + $0x38] sm:$0xff]  ;;  %v304_v31 = vld [vmem:[%s1993_s19 + $0xb0] sm:$0xff] }
  0x15   : > { %1880 = vmatprep.subr.bf16.mxu1 %v1879_v19  ;;  %v290_v32 = vld [vmem:[%s1993_s19 + $0x40] sm:$0xff]  ;;  %v305_v34 = vld [vmem:[%s1993_s19 + $0xb8] sm:$0xff]  ;;  %v291_v35 = vld [vmem:[%s1993_s19 + $0x48] sm:$0xff]  ;;  %1894 = vmatpush3.bf16.msra.mxu0 %v1891_v53 }
  0x16   : > { %1703 = vmatmul.mubr.msk.f32.gmra.mrb[2].mxu0 %vm325_vm0, %v285_v14  ;;  %v306_v36 = vld [vmem:[%s1993_s19 + $0xc0] sm:$0xff]  ;;  %v292_v37 = vld [vmem:[%s1993_s19 + $0x50] sm:$0xff]  ;;  %v307_v38 = vld [vmem:[%s1993_s19 + $0xc8] sm:$0xff]  ;;  %1896 = vmatprep.subr.bf16.mxu0 %v1895_v55 }
  0x17   : > { %1705 = vmatprep.mubr.msk.f32.mxu0 %vm325_vm0, %v286_v17  ;;  %1727 = vmatmul.mubr.msk.f32.gmra.mrb[2].mxu1 %vm325_vm0, %v301_v22  ;;  %v293_v39 = vld [vmem:[%s1993_s19 + $0x58] sm:$0xff]  ;;  %v308_v40 = vld [vmem:[%s1993_s19 + $0xd0] sm:$0xff]  ;;  %v294_v41 = vld [vmem:[%s1993_s19 + $0x60] sm:$0xff] }
  0x18   : > { %1729 = vmatprep.mubr.msk.f32.mxu1 %vm325_vm0, %v302_v24  ;;  %1882 = vmatpush3.bf16.msra.mxu1 %v1879_v19  ;;  %v309_v42 = vld [vmem:[%s1993_s19 + $0xd8] sm:$0xff]  ;;  %v295_v43 = vld [vmem:[%s1993_s19 + $0x68] sm:$0xff]  ;;  %v310_v44 = vld [vmem:[%s1993_s19 + $0xe0] sm:$0xff] }
  0x19   : > { %1884 = vmatprep.subr.bf16.mxu1 %v1883_v26  ;;  %v296_v45 = vld [vmem:[%s1993_s19 + $0x70] sm:$0xff]  ;;  %v311_v46 = vld [vmem:[%s1993_s19 + $0xe8] sm:$0xff]  ;;  %v297_v47 = vld [vmem:[%s1993_s19 + $0x78] sm:$0xff]  ;;  %1898 = vmatpush3.bf16.msra.mxu0 %v1895_v55 }
  0x1a   : > { %1706 = vmatmul.mubr.msk.f32.gmra.mrb[4].mxu0 %vm325_vm0, %v287_v23  ;;  %v312_v48 = vld [vmem:[%s1993_s19 + $0xf0] sm:$0xff]  ;;  %v313_v49 = vld [vmem:[%s1993_s19 + $0xf8] sm:$0xff] }
  0x1b   : > { %1708 = vmatprep.mubr.msk.f32.mxu0 %vm325_vm0, %v288_v25  ;;  %1730 = vmatmul.mubr.msk.f32.gmra.mrb[4].mxu1 %vm325_vm0, %v303_v29 }
  0x1c   : > { %1732 = vmatprep.mubr.msk.f32.mxu1 %vm325_vm0, %v304_v31  ;;  %1886 = vmatpush3.bf16.msra.mxu1 %v1883_v26 }
  0x1d   : > { %1888 = vmatprep.subr.bf16.mxu1 %v1887_v33 }
  0x1e   : > { %1709 = vmatmul.mubr.msk.f32.gmra.mrb[6].mxu0 %vm325_vm0, %v289_v30 }
  0x1f   : > { %1711 = vmatprep.mubr.msk.f32.mxu0 %vm325_vm0, %v290_v32  ;;  %1733 = vmatmul.mubr.msk.f32.gmra.mrb[6].mxu1 %vm325_vm0, %v305_v34 }
  0x20   : > { %1735 = vmatprep.mubr.msk.f32.mxu1 %vm325_vm0, %v306_v36  ;;  %1890 = vmatpush3.bf16.msra.mxu1 %v1887_v33 }
  0x22   : > { %1712 = vmatmul.mubr.msk.f32.gmra.mrb[8].mxu0 %vm325_vm0, %v291_v35 }
  0x23   : > { %1714 = vmatprep.mubr.msk.f32.mxu0 %vm325_vm0, %v292_v37  ;;  %1736 = vmatmul.mubr.msk.f32.gmra.mrb[8].mxu1 %vm325_vm0, %v307_v38 }
  0x24   : > { %1738 = vmatprep.mubr.msk.f32.mxu1 %vm325_vm0, %v308_v40 }
  0x26   : > { %1715 = vmatmul.mubr.msk.f32.gmra.mrb[10].mxu0 %vm325_vm0, %v293_v39 }
  0x27   : > { %1717 = vmatprep.mubr.msk.f32.mxu0 %vm325_vm0, %v294_v41  ;;  %1739 = vmatmul.mubr.msk.f32.gmra.mrb[10].mxu1 %vm325_vm0, %v309_v42 }
  0x28   : > { %1741 = vmatprep.mubr.msk.f32.mxu1 %vm325_vm0, %v310_v44 }
  0x2a   : > { %1718 = vmatmul.mubr.msk.f32.gmra.mrb[12].mxu0 %vm325_vm0, %v295_v43 }
  0x2b   : > { %1720 = vmatprep.mubr.msk.f32.mxu0 %vm325_vm0, %v296_v45  ;;  %1742 = vmatmul.mubr.msk.f32.gmra.mrb[12].mxu1 %vm325_vm0, %v311_v46 }
  0x2c   : > { %1744 = vmatprep.mubr.msk.f32.mxu1 %vm325_vm0, %v312_v48 }
  0x2e   : > { %1721 = vmatmul.mubr.msk.f32.gmra.mrb[14].mxu0 %vm325_vm0, %v297_v47 }
  0x2f   : > { %1745 = vmatmul.mubr.msk.f32.gmra.mrb[14].mxu1 %vm325_vm0, %v313_v49 }
  0xe5   : > { %v1701_v57 = vpop.f32.mrb[0].mxu0 }
  0xe6   : > { %v494_v58 = vadd.f32 %v1701_v57, %v2092_v56  ;;  %v488_v59 = vpop.f32.mrb[1].mxu0  ;;  %v2096_v61 = vpop.f32.mrb[0].mxu1 }
  0xe7   : > { %v489_v60 = vadd.f32 %v2092_v56, %v488_v59  ;;  %v568_v0 = vpop.f32.mrb[1].mxu1 }
  0xe8   : > { %v648_v1 = vmax.f32 %v494_v58, 0.0  ;;  %v569_v48 = vadd.f32 %v2092_v56, %v568_v0 }
  0xe9   : > { %v647_v62 = vmax.f32 %v489_v60, 0.0  ;;  %v1704_v63 = vpop.f32.mrb[2].mxu0 }
  0xea   : > { %v504_v2 = vadd.f32 %v1704_v63, %v2092_v56  ;;  %v498_v3 = vpop.f32.mrb[3].mxu0  ;;  %v2102_v5 = vpop.f32.mrb[2].mxu1  ;;  %v663_v57 = vmax.f32 %v569_v48, 0.0 }
  0xeb   : > { %v499_v4 = vadd.f32 %v2092_v56, %v498_v3  ;;  %1763 = vmatprep.mubr.msk.f32.mxu1 %vm694_vm1, %v647_v62  ;;  %v578_v8 = vpop.f32.mrb[3].mxu1  ;;  %v574_v62 = vadd.f32 %v2096_v61, %v2092_v56 }
  0xec   : > { %1764 = vmatmul.mubr.msk.f32.vlgmr.msra.gmra.mrb[16].mxu1 %vm694_vm1, %v648_v1  ;;  %v650_v9 = vmax.f32 %v504_v2, 0.0  ;;  %v579_v58 = vadd.f32 %v2092_v56, %v578_v8  ;;  %v584_v2 = vadd.f32 %v2102_v5, %v2092_v56 }
  0xed   : > { %v649_v6 = vmax.f32 %v499_v4, 0.0  ;;  %v1707_v7 = vpop.f32.mrb[4].mxu0  ;;  %v664_v1 = vmax.f32 %v574_v62, 0.0 }
  0xee   : > { %v514_v10 = vadd.f32 %v1707_v7, %v2092_v56  ;;  %v508_v11 = vpop.f32.mrb[5].mxu0  ;;  %v2108_v13 = vpop.f32.mrb[4].mxu1  ;;  %v665_v63 = vmax.f32 %v579_v58, 0.0  ;;  %v666_v4 = vmax.f32 %v584_v2, 0.0 }
  0xef   : > { %v509_v12 = vadd.f32 %v2092_v56, %v508_v11  ;;  %1766 = vmatprep.mubr.msk.f32.mxu1 %vm694_vm1, %v649_v6  ;;  %v588_v16 = vpop.f32.mrb[5].mxu1  ;;  %v594_v6 = vadd.f32 %v2108_v13, %v2092_v56 }
  0xf0   : > { %1767 = vmatmul.mubr.msk.f32.gmra.mrb[18].mxu1 %vm694_vm1, %v650_v9  ;;  %v652_v17 = vmax.f32 %v514_v10, 0.0  ;;  %v589_v0 = vadd.f32 %v2092_v56, %v588_v16 }
  0xf1   : > { %v651_v14 = vmax.f32 %v509_v12, 0.0  ;;  %v1710_v15 = vpop.f32.mrb[6].mxu0  ;;  %v668_v9 = vmax.f32 %v594_v6, 0.0 }
  0xf2   : > { %v524_v18 = vadd.f32 %v1710_v15, %v2092_v56  ;;  %v518_v19 = vpop.f32.mrb[7].mxu0  ;;  %v2114_v21 = vpop.f32.mrb[6].mxu1  ;;  %v667_v3 = vmax.f32 %v589_v0, 0.0 }
  0xf3   : > { %v519_v20 = vadd.f32 %v2092_v56, %v518_v19  ;;  %1769 = vmatprep.mubr.msk.f32.mxu1 %vm694_vm1, %v651_v14  ;;  %v598_v24 = vpop.f32.mrb[7].mxu1  ;;  %v604_v5 = vadd.f32 %v2114_v21, %v2092_v56 }
  0xf4   : > { %1770 = vmatmul.mubr.msk.f32.gmra.mrb[20].mxu1 %vm694_vm1, %v652_v17  ;;  %v654_v25 = vmax.f32 %v524_v18, 0.0  ;;  %v599_v61 = vadd.f32 %v2092_v56, %v598_v24 }
  0xf5   : > { %v653_v22 = vmax.f32 %v519_v20, 0.0  ;;  %v1713_v23 = vpop.f32.mrb[8].mxu0  ;;  %v670_v12 = vmax.f32 %v604_v5, 0.0 }
  0xf6   : > { %v534_v26 = vadd.f32 %v1713_v23, %v2092_v56  ;;  %v528_v27 = vpop.f32.mrb[9].mxu0  ;;  %v1737_v29 = vpop.f32.mrb[8].mxu1  ;;  %v669_v7 = vmax.f32 %v599_v61, 0.0 }
  0xf7   : > { %v529_v28 = vadd.f32 %v2092_v56, %v528_v27  ;;  %1772 = vmatprep.mubr.msk.f32.mxu1 %vm694_vm1, %v653_v22  ;;  %v608_v32 = vpop.f32.mrb[9].mxu1  ;;  %v614_v13 = vadd.f32 %v1737_v29, %v2092_v56 }
  0xf8   : > { %1773 = vmatmul.mubr.msk.f32.gmra.mrb[22].mxu1 %vm694_vm1, %v654_v25  ;;  %v656_v33 = vmax.f32 %v534_v26, 0.0  ;;  %v609_v8 = vadd.f32 %v2092_v56, %v608_v32  ;;  %v2173_v26 = vld [vmem:[%s2354_s4] ss:$0 sm:$0xff] }
  0xf9   : > { %v655_v30 = vmax.f32 %v529_v28, 0.0  ;;  %v1716_v31 = vpop.f32.mrb[10].mxu0  ;;  %v672_v16 = vmax.f32 %v614_v13, 0.0 }
  0xfa   : > { %v544_v34 = vadd.f32 %v1716_v31, %v2092_v56  ;;  %v538_v35 = vpop.f32.mrb[11].mxu0  ;;  %v1740_v37 = vpop.f32.mrb[10].mxu1  ;;  %v671_v10 = vmax.f32 %v609_v8, 0.0 }
  0xfb   : > { %v539_v36 = vadd.f32 %v2092_v56, %v538_v35  ;;  %1775 = vmatprep.mubr.msk.f32.mxu1 %vm694_vm1, %v655_v30  ;;  %v618_v40 = vpop.f32.mrb[11].mxu1  ;;  %v624_v17 = vadd.f32 %v1740_v37, %v2092_v56 }
  0xfc   : > { %1776 = vmatmul.mubr.msk.f32.gmra.mrb[24].mxu1 %vm694_vm1, %v656_v33  ;;  %v658_v41 = vmax.f32 %v544_v34, 0.0  ;;  %v619_v11 = vadd.f32 %v2092_v56, %v618_v40 }
  0xfd   : > { %v657_v38 = vmax.f32 %v539_v36, 0.0  ;;  %v1719_v39 = vpop.f32.mrb[12].mxu0  ;;  %v674_v20 = vmax.f32 %v624_v17, 0.0 }
  0xfe   : > { %v554_v42 = vadd.f32 %v1719_v39, %v2092_v56  ;;  %v548_v43 = vpop.f32.mrb[13].mxu0  ;;  %v1743_v45 = vpop.f32.mrb[12].mxu1  ;;  %v673_v14 = vmax.f32 %v619_v11, 0.0 }
  0xff   : > { %v549_v44 = vadd.f32 %v2092_v56, %v548_v43  ;;  %1778 = vmatprep.mubr.msk.f32.mxu1 %vm694_vm1, %v657_v38  ;;  %v628_v49 = vpop.f32.mrb[13].mxu1  ;;  %v634_v21 = vadd.f32 %v1743_v45, %v2092_v56 }
 0x100   : > { %1779 = vmatmul.mubr.msk.f32.gmra.mrb[26].mxu1 %vm694_vm1, %v658_v41  ;;  %v660_v50 = vmax.f32 %v554_v42, 0.0  ;;  %v629_v15 = vadd.f32 %v2092_v56, %v628_v49 }
 0x101   : > { %v659_v46 = vmax.f32 %v549_v44, 0.0  ;;  %v1722_v47 = vpop.f32.mrb[14].mxu0  ;;  %v676_v23 = vmax.f32 %v634_v21, 0.0 }
 0x102   : > { %v564_v51 = vadd.f32 %v1722_v47, %v2092_v56  ;;  %v558_v52 = vpop.f32.mrb[15].mxu0  ;;  %v1746_v54 = vpop.f32.mrb[14].mxu1  ;;  %v675_v18 = vmax.f32 %v629_v15, 0.0 }
 0x103   : > { %v559_v53 = vadd.f32 %v2092_v56, %v558_v52  ;;  %1781 = vmatprep.mubr.msk.f32.mxu1 %vm694_vm1, %v659_v46  ;;  %v638_v59 = vpop.f32.mrb[15].mxu1  ;;  %v644_v24 = vadd.f32 %v1746_v54, %v2092_v56 }
 0x104   : > { %1782 = vmatmul.mubr.msk.f32.gmra.mrb[28].mxu1 %vm694_vm1, %v660_v50  ;;  %v662_v60 = vmax.f32 %v564_v51, 0.0  ;;  %v639_v19 = vadd.f32 %v2092_v56, %v638_v59 }
 0x105   : > { %v661_v55 = vmax.f32 %v559_v53, 0.0  ;;  %v678_v25 = vmax.f32 %v644_v24, 0.0 }
 0x106   : > { %v677_v22 = vmax.f32 %v639_v19, 0.0 }
 0x107   : > { %1784 = vmatprep.mubr.msk.f32.mxu1 %vm694_vm1, %v661_v55 }
 0x108   : > { %1785 = vmatmul.mubr.msk.f32.gmra.mrb[30].mxu1 %vm694_vm1, %v662_v60 }
 0x109   : > { %1787 = vmatprep.mubr.msk.f32.mxu1 %vm694_vm1, %v663_v57 }
 0x10c   : > { %1788 = vmatmul.mubr.msk.f32.gmra.mrb[32].mxu1 %vm694_vm1, %v664_v1 }
 0x10d   : > { %1790 = vmatprep.mubr.msk.f32.mxu1 %vm694_vm1, %v665_v63 }
 0x110   : > { %1791 = vmatmul.mubr.msk.f32.gmra.mrb[34].mxu1 %vm694_vm1, %v666_v4 }
 0x111   : > { %1793 = vmatprep.mubr.msk.f32.mxu1 %vm694_vm1, %v667_v3 }
 0x114   : > { %1794 = vmatmul.mubr.msk.f32.gmra.mrb[36].mxu1 %vm694_vm1, %v668_v9 }
 0x115   : > { %1796 = vmatprep.mubr.msk.f32.mxu1 %vm694_vm1, %v669_v7 }
 0x118   : > { %1797 = vmatmul.mubr.msk.f32.gmra.mrb[38].mxu1 %vm694_vm1, %v670_v12 }
 0x119   : > { %1799 = vmatprep.mubr.msk.f32.mxu1 %vm694_vm1, %v671_v10 }
 0x11c   : > { %1800 = vmatmul.mubr.msk.f32.gmra.mrb[40].mxu1 %vm694_vm1, %v672_v16 }
 0x11d   : > { %1802 = vmatprep.mubr.msk.f32.mxu1 %vm694_vm1, %v673_v14 }
 0x120   : > { %1803 = vmatmul.mubr.msk.f32.gmra.mrb[42].mxu1 %vm694_vm1, %v674_v20 }
 0x121   : > { %1805 = vmatprep.mubr.msk.f32.mxu1 %vm694_vm1, %v675_v18 }
 0x124   : > { %1806 = vmatmul.mubr.msk.f32.gmra.mrb[44].mxu1 %vm694_vm1, %v676_v23 }
 0x125   : > { %1808 = vmatprep.mubr.msk.f32.mxu1 %vm694_vm1, %v677_v22 }
 0x128   : > { %1809 = vmatmul.mubr.msk.f32.gmra.mrb[46].mxu1 %vm694_vm1, %v678_v25 }
 0x1bf   : > { %v1765_v27 = vpop.f32.mrb[16].mxu1 }
 0x1c0   : > { %v863_v28 = vadd.f32 %v1765_v27, %v2173_v26  ;;  %v857_v29 = vpop.f32.mrb[17].mxu1 }
 0x1c1   : > { %v858_v30 = vadd.f32 %v2173_v26, %v857_v29 }
 0x1c2   : > { %v1017_v32 = vmax.f32 %v863_v28, 0.0 }
 0x1c3   : > { %v1016_v31 = vmax.f32 %v858_v30, 0.0  ;;  %v1768_v56 = vpop.f32.mrb[18].mxu1 }
 0x1c4   : > { %v873_v33 = vadd.f32 %v1768_v56, %v2173_v26  ;;  %v867_v34 = vpop.f32.mrb[19].mxu1 }
 0x1c5   : > { %v868_v35 = vadd.f32 %v2173_v26, %v867_v34  ;;  %1819 = vmatprep.mubr.msk.f32.mxu0 %vm325_vm0, %v1016_v31 }
 0x1c6   : > { %1820 = vmatmul.mubr.msk.f32.vlgmr.msra.gmra.mrb[16].mxu0 %vm325_vm0, %v1017_v32  ;;  %v1019_v38 = vmax.f32 %v873_v33, 0.0 }
 0x1c7   : > { %v1018_v36 = vmax.f32 %v868_v35, 0.0  ;;  %v1771_v37 = vpop.f32.mrb[20].mxu1 }
 0x1c8   : > { %v883_v39 = vadd.f32 %v1771_v37, %v2173_v26  ;;  %v877_v40 = vpop.f32.mrb[21].mxu1 }
 0x1c9   : > { %v878_v41 = vadd.f32 %v2173_v26, %v877_v40  ;;  %1822 = vmatprep.mubr.msk.f32.mxu0 %vm325_vm0, %v1018_v36 }
 0x1ca   : > { %1823 = vmatmul.mubr.msk.f32.gmra.mrb[18].mxu0 %vm325_vm0, %v1019_v38  ;;  %v1021_v44 = vmax.f32 %v883_v39, 0.0 }
 0x1cb   : > { %v1020_v42 = vmax.f32 %v878_v41, 0.0  ;;  %v1774_v43 = vpop.f32.mrb[22].mxu1 }
 0x1cc   : > { %v893_v45 = vadd.f32 %v1774_v43, %v2173_v26  ;;  %v887_v46 = vpop.f32.mrb[23].mxu1 }
 0x1cd   : > { %v888_v47 = vadd.f32 %v2173_v26, %v887_v46  ;;  %1825 = vmatprep.mubr.msk.f32.mxu0 %vm325_vm0, %v1020_v42 }
 0x1ce   : > { %1826 = vmatmul.mubr.msk.f32.gmra.mrb[20].mxu0 %vm325_vm0, %v1021_v44  ;;  %v1023_v50 = vmax.f32 %v893_v45, 0.0 }
 0x1cf   : > { %v1022_v48 = vmax.f32 %v888_v47, 0.0  ;;  %v1777_v49 = vpop.f32.mrb[24].mxu1 }
 0x1d0   : > { %v903_v51 = vadd.f32 %v1777_v49, %v2173_v26  ;;  %v897_v52 = vpop.f32.mrb[25].mxu1 }
 0x1d1   : > { %v898_v53 = vadd.f32 %v2173_v26, %v897_v52  ;;  %1828 = vmatprep.mubr.msk.f32.mxu0 %vm325_vm0, %v1022_v48 }
 0x1d2   : > { %1829 = vmatmul.mubr.msk.f32.gmra.mrb[22].mxu0 %vm325_vm0, %v1023_v50  ;;  %v1025_v57 = vmax.f32 %v903_v51, 0.0 }
 0x1d3   : > { %v1024_v54 = vmax.f32 %v898_v53, 0.0  ;;  %v1780_v55 = vpop.f32.mrb[26].mxu1 }
 0x1d4   : > { %v913_v58 = vadd.f32 %v1780_v55, %v2173_v26  ;;  %v907_v59 = vpop.f32.mrb[27].mxu1 }
 0x1d5   : > { %v908_v60 = vadd.f32 %v2173_v26, %v907_v59  ;;  %1831 = vmatprep.mubr.msk.f32.mxu0 %vm325_vm0, %v1024_v54 }
 0x1d6   : > { %1832 = vmatmul.mubr.msk.f32.gmra.mrb[24].mxu0 %vm325_vm0, %v1025_v57  ;;  %v1027_v0 = vmax.f32 %v913_v58, 0.0 }
 0x1d7   : > { %v1026_v62 = vmax.f32 %v908_v60, 0.0  ;;  %v1783_v63 = vpop.f32.mrb[28].mxu1  ;;  %v2242_v60 = vld [vmem:[%s2356_s6] ss:$0 sm:$0xff] }
 0x1d8   : > { %v923_v1 = vadd.f32 %v1783_v63, %v2173_v26  ;;  %v917_v2 = vpop.f32.mrb[29].mxu1 }
 0x1d9   : > { %v918_v3 = vadd.f32 %v2173_v26, %v917_v2  ;;  %1834 = vmatprep.mubr.msk.f32.mxu0 %vm325_vm0, %v1026_v62 }
 0x1da   : > { %1835 = vmatmul.mubr.msk.f32.gmra.mrb[26].mxu0 %vm325_vm0, %v1027_v0  ;;  %v1029_v6 = vmax.f32 %v923_v1, 0.0 }
 0x1db   : > { %v1028_v61 = vmax.f32 %v918_v3, 0.0  ;;  %v1786_v4 = vpop.f32.mrb[30].mxu1 }
 0x1dc   : > { %v933_v7 = vadd.f32 %v1786_v4, %v2173_v26  ;;  %v927_v8 = vpop.f32.mrb[31].mxu1 }
 0x1dd   : > { %v928_v9 = vadd.f32 %v2173_v26, %v927_v8  ;;  %1837 = vmatprep.mubr.msk.f32.mxu0 %vm325_vm0, %v1028_v61 }
 0x1de   : > { %1838 = vmatmul.mubr.msk.f32.gmra.mrb[28].mxu0 %vm325_vm0, %v1029_v6  ;;  %v1031_v11 = vmax.f32 %v933_v7, 0.0 }
 0x1df   : > { %v1030_v5 = vmax.f32 %v928_v9, 0.0  ;;  %v1789_v10 = vpop.f32.mrb[32].mxu1 }
 0x1e0   : > { %v943_v12 = vadd.f32 %v1789_v10, %v2173_v26  ;;  %v937_v13 = vpop.f32.mrb[33].mxu1 }
 0x1e1   : > { %v938_v14 = vadd.f32 %v2173_v26, %v937_v13  ;;  %1840 = vmatprep.mubr.msk.f32.mxu0 %vm325_vm0, %v1030_v5 }
 0x1e2   : > { %1841 = vmatmul.mubr.msk.f32.gmra.mrb[30].mxu0 %vm325_vm0, %v1031_v11  ;;  %v1033_v17 = vmax.f32 %v943_v12, 0.0 }
 0x1e3   : > { %v1032_v15 = vmax.f32 %v938_v14, 0.0  ;;  %v1792_v16 = vpop.f32.mrb[34].mxu1 }
 0x1e4   : > { %v953_v18 = vadd.f32 %v1792_v16, %v2173_v26  ;;  %v947_v19 = vpop.f32.mrb[35].mxu1 }
 0x1e5   : > { %v948_v20 = vadd.f32 %v2173_v26, %v947_v19  ;;  %1843 = vmatprep.mubr.msk.f32.mxu0 %vm325_vm0, %v1032_v15 }
 0x1e6   : > { %1844 = vmatmul.mubr.msk.f32.gmra.mrb[32].mxu0 %vm325_vm0, %v1033_v17  ;;  %v1035_v23 = vmax.f32 %v953_v18, 0.0 }
 0x1e7   : > { %v1034_v21 = vmax.f32 %v948_v20, 0.0  ;;  %v1795_v22 = vpop.f32.mrb[36].mxu1 }
 0x1e8   : > { %v963_v24 = vadd.f32 %v1795_v22, %v2173_v26  ;;  %v957_v25 = vpop.f32.mrb[37].mxu1 }
 0x1e9   : > { %v958_v27 = vadd.f32 %v2173_v26, %v957_v25  ;;  %1846 = vmatprep.mubr.msk.f32.mxu0 %vm325_vm0, %v1034_v21 }
 0x1ea   : > { %1847 = vmatmul.mubr.msk.f32.gmra.mrb[34].mxu0 %vm325_vm0, %v1035_v23  ;;  %v1037_v30 = vmax.f32 %v963_v24, 0.0 }
 0x1eb   : > { %v1036_v28 = vmax.f32 %v958_v27, 0.0  ;;  %v1798_v29 = vpop.f32.mrb[38].mxu1 }
 0x1ec   : > { %v973_v31 = vadd.f32 %v1798_v29, %v2173_v26  ;;  %v967_v56 = vpop.f32.mrb[39].mxu1 }
 0x1ed   : > { %v968_v32 = vadd.f32 %v2173_v26, %v967_v56  ;;  %1849 = vmatprep.mubr.msk.f32.mxu0 %vm325_vm0, %v1036_v28 }
 0x1ee   : > { %1850 = vmatmul.mubr.msk.f32.gmra.mrb[36].mxu0 %vm325_vm0, %v1037_v30  ;;  %v1039_v35 = vmax.f32 %v973_v31, 0.0 }
 0x1ef   : > { %v1038_v33 = vmax.f32 %v968_v32, 0.0  ;;  %v1801_v34 = vpop.f32.mrb[40].mxu1 }
 0x1f0   : > { %v983_v36 = vadd.f32 %v1801_v34, %v2173_v26  ;;  %v977_v37 = vpop.f32.mrb[41].mxu1 }
 0x1f1   : > { %v978_v38 = vadd.f32 %v2173_v26, %v977_v37  ;;  %1852 = vmatprep.mubr.msk.f32.mxu0 %vm325_vm0, %v1038_v33 }
 0x1f2   : > { %1853 = vmatmul.mubr.msk.f32.gmra.mrb[38].mxu0 %vm325_vm0, %v1039_v35  ;;  %v1041_v41 = vmax.f32 %v983_v36, 0.0 }
 0x1f3   : > { %v1040_v39 = vmax.f32 %v978_v38, 0.0  ;;  %v1804_v40 = vpop.f32.mrb[42].mxu1 }
 0x1f4   : > { %v993_v42 = vadd.f32 %v1804_v40, %v2173_v26  ;;  %v987_v43 = vpop.f32.mrb[43].mxu1 }
 0x1f5   : > { %v988_v44 = vadd.f32 %v2173_v26, %v987_v43  ;;  %1855 = vmatprep.mubr.msk.f32.mxu0 %vm325_vm0, %v1040_v39 }
 0x1f6   : > { %1856 = vmatmul.mubr.msk.f32.gmra.mrb[40].mxu0 %vm325_vm0, %v1041_v41  ;;  %v1043_v47 = vmax.f32 %v993_v42, 0.0 }
 0x1f7   : > { %v1042_v45 = vmax.f32 %v988_v44, 0.0  ;;  %v1807_v46 = vpop.f32.mrb[44].mxu1 }
 0x1f8   : > { %v1003_v48 = vadd.f32 %v1807_v46, %v2173_v26  ;;  %v997_v49 = vpop.f32.mrb[45].mxu1 }
 0x1f9   : > { %v998_v50 = vadd.f32 %v2173_v26, %v997_v49  ;;  %1858 = vmatprep.mubr.msk.f32.mxu0 %vm325_vm0, %v1042_v45 }
 0x1fa   : > { %1859 = vmatmul.mubr.msk.f32.gmra.mrb[42].mxu0 %vm325_vm0, %v1043_v47  ;;  %v1045_v53 = vmax.f32 %v1003_v48, 0.0 }
 0x1fb   : > { %v1044_v51 = vmax.f32 %v998_v50, 0.0  ;;  %v1810_v52 = vpop.f32.mrb[46].mxu1 }
 0x1fc   : > { %v1013_v54 = vadd.f32 %v1810_v52, %v2173_v26  ;;  %v1007_v55 = vpop.f32.mrb[47].mxu1 }
 0x1fd   : > { %v1008_v57 = vadd.f32 %v2173_v26, %v1007_v55  ;;  %1861 = vmatprep.mubr.msk.f32.mxu0 %vm325_vm0, %v1044_v51 }
 0x1fe   : > { %1862 = vmatmul.mubr.msk.f32.gmra.mrb[44].mxu0 %vm325_vm0, %v1045_v53  ;;  %v1047_v59 = vmax.f32 %v1013_v54, 0.0 }
 0x1ff   : > { %v1046_v58 = vmax.f32 %v1008_v57, 0.0 }
 0x201   : > { %1864 = vmatprep.mubr.msk.f32.mxu0 %vm325_vm0, %v1046_v58 }
 0x202   : > { %1865 = vmatmul.mubr.msk.f32.gmra.mrb[46].mxu0 %vm325_vm0, %v1047_v59 }
 0x299   : > { %v1821_v26 = vpop.f32.mrb[16].mxu0 }
 0x29a   : > { %v1227_v62 = vadd.f32 %v1821_v26, %v2242_v60  ;;  %v1221_v63 = vpop.f32.mrb[17].mxu0 }
 0x29b   : > { %v1222_v0 = vadd.f32 %v2242_v60, %v1221_v63 }
 0x29c   : > { %1382 = vst.msk [vmem:[%s2249_s29 + $0x8] sm:$0xff] %vm1380_vm2, %v1227_v62 }
 0x29d   : > { %1381 = vst.msk [vmem:[%s2249_s29] sm:$0xff] %vm1380_vm2, %v1222_v0  ;;  %v1824_v1 = vpop.f32.mrb[18].mxu0 }
 0x29e   : > { %v1237_v2 = vadd.f32 %v1824_v1, %v2242_v60  ;;  %v1231_v3 = vpop.f32.mrb[19].mxu0 }
 0x29f   : > { %v1232_v61 = vadd.f32 %v2242_v60, %v1231_v3 }
 0x2a0   : > { %1384 = vst.msk [vmem:[%s2249_s29 + $0x18] sm:$0xff] %vm1380_vm2, %v1237_v2 }
 0x2a1   : > { %1383 = vst.msk [vmem:[%s2249_s29 + $0x10] sm:$0xff] %vm1380_vm2, %v1232_v61  ;;  %v1827_v4 = vpop.f32.mrb[20].mxu0 }
 0x2a2   : > { %v1247_v6 = vadd.f32 %v1827_v4, %v2242_v60  ;;  %v1241_v7 = vpop.f32.mrb[21].mxu0 }
 0x2a3   : > { %v1242_v8 = vadd.f32 %v2242_v60, %v1241_v7 }
 0x2a4   : > { %1386 = vst.msk [vmem:[%s2249_s29 + $0x28] sm:$0xff] %vm1380_vm2, %v1247_v6 }
 0x2a5   : > { %1385 = vst.msk [vmem:[%s2249_s29 + $0x20] sm:$0xff] %vm1380_vm2, %v1242_v8  ;;  %v1830_v9 = vpop.f32.mrb[22].mxu0 }
 0x2a6   : > { %v1257_v5 = vadd.f32 %v1830_v9, %v2242_v60  ;;  %v1251_v10 = vpop.f32.mrb[23].mxu0 }
 0x2a7   : > { %v1252_v11 = vadd.f32 %v2242_v60, %v1251_v10 }
 0x2a8   : > { %1388 = vst.msk [vmem:[%s2249_s29 + $0x38] sm:$0xff] %vm1380_vm2, %v1257_v5 }
 0x2a9   : > { %1387 = vst.msk [vmem:[%s2249_s29 + $0x30] sm:$0xff] %vm1380_vm2, %v1252_v11  ;;  %v1833_v12 = vpop.f32.mrb[24].mxu0 }
 0x2aa   : > { %v1267_v13 = vadd.f32 %v1833_v12, %v2242_v60  ;;  %v1261_v14 = vpop.f32.mrb[25].mxu0 }
 0x2ab   : > { %v1262_v15 = vadd.f32 %v2242_v60, %v1261_v14 }
 0x2ac   : > { %1390 = vst.msk [vmem:[%s2249_s29 + $0x48] sm:$0xff] %vm1380_vm2, %v1267_v13 }
 0x2ad   : > { %1389 = vst.msk [vmem:[%s2249_s29 + $0x40] sm:$0xff] %vm1380_vm2, %v1262_v15  ;;  %v1836_v16 = vpop.f32.mrb[26].mxu0 }
 0x2ae   : > { %v1277_v17 = vadd.f32 %v1836_v16, %v2242_v60  ;;  %v1271_v18 = vpop.f32.mrb[27].mxu0 }
 0x2af   : > { %v1272_v19 = vadd.f32 %v2242_v60, %v1271_v18 }
 0x2b0   : > { %1392 = vst.msk [vmem:[%s2249_s29 + $0x58] sm:$0xff] %vm1380_vm2, %v1277_v17 }
 0x2b1   : > { %1391 = vst.msk [vmem:[%s2249_s29 + $0x50] sm:$0xff] %vm1380_vm2, %v1272_v19  ;;  %v1839_v20 = vpop.f32.mrb[28].mxu0 }
 0x2b2   : > { %v1287_v21 = vadd.f32 %v1839_v20, %v2242_v60  ;;  %v1281_v22 = vpop.f32.mrb[29].mxu0 }
 0x2b3   : > { %v1282_v23 = vadd.f32 %v2242_v60, %v1281_v22 }
 0x2b4   : > { %1394 = vst.msk [vmem:[%s2249_s29 + $0x68] sm:$0xff] %vm1380_vm2, %v1287_v21 }
 0x2b5   : > { %1393 = vst.msk [vmem:[%s2249_s29 + $0x60] sm:$0xff] %vm1380_vm2, %v1282_v23  ;;  %v1842_v24 = vpop.f32.mrb[30].mxu0 }
 0x2b6   : > { %v1297_v25 = vadd.f32 %v1842_v24, %v2242_v60  ;;  %v1291_v27 = vpop.f32.mrb[31].mxu0 }
 0x2b7   : > { %v1292_v28 = vadd.f32 %v2242_v60, %v1291_v27 }
 0x2b8   : > { %1396 = vst.msk [vmem:[%s2249_s29 + $0x78] sm:$0xff] %vm1380_vm2, %v1297_v25 }
 0x2b9   : > { %1395 = vst.msk [vmem:[%s2249_s29 + $0x70] sm:$0xff] %vm1380_vm2, %v1292_v28  ;;  %v1845_v29 = vpop.f32.mrb[32].mxu0 }
 0x2ba   : > { %v1307_v30 = vadd.f32 %v1845_v29, %v2242_v60  ;;  %v1301_v31 = vpop.f32.mrb[33].mxu0 }
 0x2bb   : > { %v1302_v56 = vadd.f32 %v2242_v60, %v1301_v31 }
 0x2bc   : > { %1398 = vst.msk [vmem:[%s2249_s29 + $0x88] sm:$0xff] %vm1380_vm2, %v1307_v30 }
 0x2bd   : > { %1397 = vst.msk [vmem:[%s2249_s29 + $0x80] sm:$0xff] %vm1380_vm2, %v1302_v56  ;;  %v1848_v32 = vpop.f32.mrb[34].mxu0 }
 0x2be   : > { %v1317_v33 = vadd.f32 %v1848_v32, %v2242_v60  ;;  %v1311_v34 = vpop.f32.mrb[35].mxu0 }
 0x2bf   : > { %v1312_v35 = vadd.f32 %v2242_v60, %v1311_v34 }
 0x2c0   : > { %1400 = vst.msk [vmem:[%s2249_s29 + $0x98] sm:$0xff] %vm1380_vm2, %v1317_v33 }
 0x2c1   : > { %1399 = vst.msk [vmem:[%s2249_s29 + $0x90] sm:$0xff] %vm1380_vm2, %v1312_v35  ;;  %v1851_v36 = vpop.f32.mrb[36].mxu0 }
 0x2c2   : > { %v1327_v37 = vadd.f32 %v1851_v36, %v2242_v60  ;;  %v1321_v38 = vpop.f32.mrb[37].mxu0 }
 0x2c3   : > { %v1322_v39 = vadd.f32 %v2242_v60, %v1321_v38 }
 0x2c4   : > { %1402 = vst.msk [vmem:[%s2249_s29 + $0xa8] sm:$0xff] %vm1380_vm2, %v1327_v37 }
 0x2c5   : > { %1401 = vst.msk [vmem:[%s2249_s29 + $0xa0] sm:$0xff] %vm1380_vm2, %v1322_v39  ;;  %v1854_v40 = vpop.f32.mrb[38].mxu0 }
 0x2c6   : > { %v1337_v41 = vadd.f32 %v1854_v40, %v2242_v60  ;;  %v1331_v42 = vpop.f32.mrb[39].mxu0 }
 0x2c7   : > { %v1332_v43 = vadd.f32 %v2242_v60, %v1331_v42 }
 0x2c8   : > { %1404 = vst.msk [vmem:[%s2249_s29 + $0xb8] sm:$0xff] %vm1380_vm2, %v1337_v41 }
 0x2c9   : > { %1403 = vst.msk [vmem:[%s2249_s29 + $0xb0] sm:$0xff] %vm1380_vm2, %v1332_v43  ;;  %v1857_v44 = vpop.f32.mrb[40].mxu0 }
 0x2ca   : > { %v1347_v45 = vadd.f32 %v1857_v44, %v2242_v60  ;;  %v1341_v46 = vpop.f32.mrb[41].mxu0 }
 0x2cb   : > { %v1342_v47 = vadd.f32 %v2242_v60, %v1341_v46 }
 0x2cc   : > { %1406 = vst.msk [vmem:[%s2249_s29 + $0xc8] sm:$0xff] %vm1380_vm2, %v1347_v45 }
 0x2cd   : > { %1405 = vst.msk [vmem:[%s2249_s29 + $0xc0] sm:$0xff] %vm1380_vm2, %v1342_v47  ;;  %v1860_v48 = vpop.f32.mrb[42].mxu0 }
 0x2ce   : > { %v1357_v49 = vadd.f32 %v1860_v48, %v2242_v60  ;;  %v1351_v50 = vpop.f32.mrb[43].mxu0 }
 0x2cf   : > { %v1352_v51 = vadd.f32 %v2242_v60, %v1351_v50 }
 0x2d0   : > { %1408 = vst.msk [vmem:[%s2249_s29 + $0xd8] sm:$0xff] %vm1380_vm2, %v1357_v49 }
 0x2d1   : > { %1407 = vst.msk [vmem:[%s2249_s29 + $0xd0] sm:$0xff] %vm1380_vm2, %v1352_v51  ;;  %v1863_v52 = vpop.f32.mrb[44].mxu0 }
 0x2d2   : > { %v1367_v53 = vadd.f32 %v1863_v52, %v2242_v60  ;;  %v1361_v54 = vpop.f32.mrb[45].mxu0 }
 0x2d3   : > { %v1362_v55 = vadd.f32 %v2242_v60, %v1361_v54 }
 0x2d4   : > { %1410 = vst.msk [vmem:[%s2249_s29 + $0xe8] sm:$0xff] %vm1380_vm2, %v1367_v53 }
 0x2d5   : > { %1409 = vst.msk [vmem:[%s2249_s29 + $0xe0] sm:$0xff] %vm1380_vm2, %v1362_v55  ;;  %v1866_v57 = vpop.f32.mrb[46].mxu0 }
 0x2d6   : > { %v1377_v58 = vadd.f32 %v1866_v57, %v2242_v60  ;;  %v1371_v59 = vpop.f32.mrb[47].mxu0 }
 0x2d7   : > { %v1372_v26 = vadd.f32 %v2242_v60, %v1371_v59 }
 0x2d8   : > { %1412 = vst.msk [vmem:[%s2249_s29 + $0xf8] sm:$0xff] %vm1380_vm2, %v1377_v58 }
 0x2d9   : > { %1411 = vst.msk [vmem:[%s2249_s29 + $0xf0] sm:$0xff] %vm1380_vm2, %v1372_v26 }
 0x2da PF: > { %s17_s24 = sadd.s32 1, %s1917_s24  }
 0x2db   : > { %p14_p4 = scmp.ge.s32.totalorder %s17_s24, 4  }
 0x2dd   :  { %16 = sbr.rel (!%p14_p4) target bundleno = 1 (0x1), region = 78 }

</bundles_post_ra>
